<compile_context>
chip_gen: v7x
topology: tpu7x:2x2x1
jax: 0.10.0
libtpu: 0.0.40
codegen_flags: <defaults>
</compile_context>

<pallas_src>
import math

import jax
import jax.numpy as jnp
from jax.experimental import pallas as pl
from jax.experimental.pallas import tpu as pltpu


def _make_kernel(d_chunk, n_chunks):
    def kernel(x_ref, w_ref, o_ref):
        # x_ref: (TB, S, D) block of inputs (native dtype)
        # w_ref: (1, D)     weight, pre-scaled by 1/sqrt(D), float32
        # o_ref: (TB, S)    lane-dense softmax output (float32)
        w = w_ref[...]                                            # (1, D) f32
        acc = None
        for c in range(n_chunks):                                 # static, unrolled
            lo = c * d_chunk
            xc = x_ref[:, :, lo:lo + d_chunk].astype(jnp.float32)  # (TB, S, dc)
            wc = w[:, lo:lo + d_chunk][None]                        # (1, 1, dc)
            part = jnp.sum(xc * wc, axis=-1)                        # (TB, S)
            acc = part if acc is None else acc + part
        # Softmax over the sequence axis (the lane axis of the (TB, S) tile).
        m = jnp.max(acc, axis=-1, keepdims=True)
        e = jnp.exp(acc - m)
        o_ref[...] = (e / jnp.sum(e, axis=-1, keepdims=True)).astype(o_ref.dtype)

    return kernel


def _vmem_capacity_bytes():
    try:
        info = pltpu.get_tpu_info()
        cap = int(getattr(info, "vmem_capacity_bytes", 0))
        if cap > 0:
            return cap
    except Exception:
        pass
    return 64 * 1024 * 1024  # conservative fallback (v7x-sized VMEM)


def simple_dot_product_attention(x, weight, bias=None):
    """x: (B, S, D); weight: (1, D); bias: (1,) or None. Returns (B, S, 1) f32.

    `bias` is accepted for API parity with the PyTorch module but ignored:
    softmax over the sequence axis is invariant to the per-row constant
    bias / sqrt(D), so dropping it is mathematically exact.
    """
    B, S, D = x.shape
    del bias

    scale = math.sqrt(float(D))
    w_scaled = (weight.astype(jnp.float32) / scale).reshape(1, D)

    # D-chunking for the in-kernel contraction: bounds the live f32 temporaries
    # to one (TB, S, d_chunk) chunk instead of a full (TB, S, D) block.
    if D > 256 and D % 128 == 0:
        d_chunk = 256 if D % 256 == 0 else 128
    else:
        d_chunk = D
    n_chunks = D // d_chunk

    # --- Generation-aware tiling --------------------------------------------
    cap = _vmem_capacity_bytes()                  # 128 MiB v5e/v6e, 64 MiB v7x
    budget = min(cap // 2, 64 * 1024 * 1024)      # scoped-VMEM budget
    itemsize = jnp.dtype(x.dtype).itemsize
    row_bytes = S * D * itemsize                  # one batch row of x

    # Estimated steady-state VMEM footprint per batch row in the block:
    #   2x double-buffered x block + chunk temporaries (cast + product)
    #   + small softmax temporaries + 2x double-buffered output block.
    per_row = (2 * row_bytes
               + 2 * S * d_chunk * 4
               + 4 * S * 4
               + 2 * S * 4)
    fixed = 2 * D * 4 + (1 << 20)                 # resident weight + slack

    target_input = (8 if cap >= 96 * 1024 * 1024 else 4) * 1024 * 1024
    tb_target = max(1, target_input // max(row_bytes, 1))
    tb_max = max(1, (budget - fixed) // max(per_row, 1))
    tb = int(min(tb_target, tb_max, B))

    if tb < B:
        # Keep the output block's sublane dim a multiple of 8; always round
        # DOWN (never up past the VMEM budget).
        tb = (tb // 8) * 8 if tb >= 8 else min(8, B)
    if B >= 16:
        # Never collapse to a single grid step: keep >= 2 "parallel" steps so
        # both v7x TensorCores get work (no cost on single-TC v5e/v6e).
        tb = min(tb, max(8, ((B // 2) // 8) * 8))
    tb = max(1, min(tb, B))
    grid_b = pl.cdiv(B, tb)

    # Scoped-VMEM limit from the actual footprint: never below what the chosen
    # block needs, never above physical VMEM minus headroom.
    needed = tb * per_row + fixed
    vmem_limit = int(min(max(budget, needed), cap - 4 * 1024 * 1024))

    out2d = pl.pallas_call(
        _make_kernel(d_chunk, n_chunks),
        out_shape=jax.ShapeDtypeStruct((B, S), jnp.float32),
        grid_spec=pltpu.PrefetchScalarGridSpec(
            num_scalar_prefetch=0,
            grid=(grid_b,),
            in_specs=[
                pl.BlockSpec((tb, S, D), lambda i: (i, 0, 0)),
                pl.BlockSpec((1, D), lambda i: (0, 0)),      # resident weight
            ],
            out_specs=pl.BlockSpec((tb, S), lambda i: (i, 0)),
        ),
        compiler_params=pltpu.CompilerParams(
            dimension_semantics=("parallel",),
            vmem_limit_bytes=vmem_limit,
        ),
    )(x, w_scaled)

    # Output dtype is float32 regardless of input dtype (matches the f32
    # reference; a bf16-run PyTorch module would return bf16).
    return out2d.reshape(B, S, 1)


def _reference(x, weight, bias):
    scale = math.sqrt(float(x.shape[-1]))
    scores = (jnp.einsum("bsd,od->bso", x, weight) + bias) / scale
    return jax.nn.softmax(scores, axis=-2)


if __name__ == "__main__":
    B, S, D = 2, 8, 32

    key = jax.random.PRNGKey(0)
    kx, kw, kb = jax.random.split(key, 3)

    x = jax.random.normal(kx, (B, S, D), dtype=jnp.float32)
    # Deterministic Linear(dim, 1) params (PyTorch-style uniform init bound).
    bound = 1.0 / math.sqrt(D)
    weight = jax.random.uniform(kw, (1, D), jnp.float32, -bound, bound)
    bias = jax.random.uniform(kb, (1,), jnp.float32, -bound, bound)

    out = simple_dot_product_attention(x, weight, bias)
    out = jax.block_until_ready(out)

    ref = _reference(x, weight, bias)
    assert out.shape == (B, S, 1)
    assert jnp.allclose(out, ref, atol=1e-5, rtol=1e-5)

    print("KERNEL_OK")
</pallas_src>

<mosaic_0001>
module attributes {stable_mosaic.version = 11 : i64} {
  func.func @kernel(%arg0: i32, %arg1: memref<2x8x32xf32, #tpu.memory_space<vmem>>, %arg2: memref<1x32xf32, #tpu.memory_space<vmem>>, %arg3: memref<2x8xf32, #tpu.memory_space<vmem>>) attributes {dimension_semantics = [#tpu.dimension_semantics<parallel>], iteration_bounds = array<i64: 1>, scalar_prefetch = 0 : i64, scratch_operands = 0 : i64, tpu.core_type = #tpu.core_type<tc>, window_params = [{transform_indices = @transform_0, window_bounds = array<i64: 2, 8, 32>}, {pipeline_mode = #tpu.pipeline_mode<synchronous>, transform_indices = @transform_1, window_bounds = array<i64: 1, 32>}, {transform_indices = @transform_2, window_bounds = array<i64: 2, 8>}]} {
    %c0 = arith.constant 0 : index
    %c0_0 = arith.constant 0 : index
    %0 = vector.load %arg2[%c0, %c0_0] : memref<1x32xf32, #tpu.memory_space<vmem>>, vector<1x32xf32>
    %c0_1 = arith.constant 0 : index
    %c0_2 = arith.constant 0 : index
    %c0_3 = arith.constant 0 : index
    %1 = vector.load %arg1[%c0_1, %c0_2, %c0_3] : memref<2x8x32xf32, #tpu.memory_space<vmem>>, vector<2x8x32xf32>
    %2 = vector.shape_cast %0 : vector<1x32xf32> to vector<1x1x32xf32>
    %3 = vector.broadcast %2 : vector<1x1x32xf32> to vector<2x8x32xf32>
    %4 = arith.mulf %1, %3 : vector<2x8x32xf32>
    %cst = arith.constant dense<0.000000e+00> : vector<2x8xf32>
    %5 = vector.multi_reduction <add>, %4, %cst [2] : vector<2x8x32xf32> to vector<2x8xf32>
    %cst_4 = arith.constant dense<0xFF800000> : vector<2xf32>
    %6 = vector.multi_reduction <maximumf>, %5, %cst_4 [1] : vector<2x8xf32> to vector<2xf32>
    %7 = vector.shape_cast %6 : vector<2xf32> to vector<2x1xf32>
    %8 = vector.broadcast %7 : vector<2x1xf32> to vector<2x8xf32>
    %9 = arith.subf %5, %8 : vector<2x8xf32>
    %10 = math.exp %9 : vector<2x8xf32>
    %cst_5 = arith.constant dense<0.000000e+00> : vector<2xf32>
    %11 = vector.multi_reduction <add>, %10, %cst_5 [1] : vector<2x8xf32> to vector<2xf32>
    %12 = vector.shape_cast %11 : vector<2xf32> to vector<2x1xf32>
    %13 = vector.broadcast %12 : vector<2x1xf32> to vector<2x8xf32>
    %14 = arith.divf %10, %13 : vector<2x8xf32>
    %c0_6 = arith.constant 0 : index
    %c0_7 = arith.constant 0 : index
    %15 = vector.load %arg3[%c0_6, %c0_7] : memref<2x8xf32, #tpu.memory_space<vmem>>, vector<2x8xf32>
    tpu.vector_store %arg3[%c0_6, %c0_7], %14 {strides = array<i32>} : memref<2x8xf32, #tpu.memory_space<vmem>>, vector<2x8xf32>,
    return
  }
  func.func @transform_0(%arg0: i32) -> (i32, i32, i32) {
    %c0_i32 = arith.constant 0 : i32
    %c0_i32_0 = arith.constant 0 : i32
    %c0_i32_1 = arith.constant 0 : i32
    return %arg0, %c0_i32, %c0_i32_0 : i32, i32, i32
  }
  func.func @transform_1(%arg0: i32) -> (i32, i32) {
    %c0_i32 = arith.constant 0 : i32
    %c0_i32_0 = arith.constant 0 : i32
    %c0_i32_1 = arith.constant 0 : i32
    return %c0_i32, %c0_i32_0 : i32, i32
  }
  func.func @transform_2(%arg0: i32) -> (i32, i32) {
    %c0_i32 = arith.constant 0 : i32
    %c0_i32_0 = arith.constant 0 : i32
    return %arg0, %c0_i32 : i32, i32
  }
}

</mosaic_0001>

<bundles_post_ra>
// kernel: tpu_custom_call.1
= control target key start
LH: loop header
LB: loop body
LE: loop exit
PB: predicated region body
PF: predicated region fallthrough
CT: control target
= control target key end

     0   :  { %7 = vsyncpa [#allocation3], 0  ;;  %s267_s0 = inlined_call_operand.hbm [shape: f32[2,8,32], index: 0, kind: input, shape index: {}]   ;;  %s268_s1 = inlined_call_operand.vmem [shape: f32[1,32], index: 1, kind: input, shape index: {}]   ;;  %s269_s2 = inlined_call_operand.hbm [shape: f32[2,8], index: 2, kind: output, shape index: {}]  }
   0x1   :  { %8 = vsyncpa [#allocation4], 0  ;;  %s214_s9 = smov [#allocation2]   ;;  %s166_s13 = scalar_lea.hbm %s267_s0, 256 }
   0x2   :  { %s14_s10 = sshll.u32 %s214_s9, 4  ;;  %p167_p0 = scmp.ne.s32.totalorder %s267_s0, %s166_s13  ;;  %s15_s10 = int_to_ptr.vmem [resolvable:$true] %s14_s10 }
   0x3   :  { %p170_p1 = scmp.lt.u32.totalorder %s166_s13, %s267_s0 }
   0x5   :  { %p172_p2 = pnand %p170_p1, %p167_p0 }
   0x7   :  { %175 = shalt.err (!%p172_p2)
}
   0x8   :  { %s176_s18 = scalar_lea.vmem %s15_s10, 256  ;;  %p181_p4 = scmp.lt.s32.totalorder %s15_s10, %s15_s10 }
   0x9   :  { %p177_p3 = scmp.ne.s32.totalorder %s15_s10, %s176_s18  ;;  %p182_p5 = scmp.lt.s32.totalorder %s176_s18, %s176_s18 }
   0xb   :  { %p183_p6 = por %p182_p5, %p181_p4 }
   0xd   :  { %p184_p7 = pnand %p183_p6, %p177_p3 }
   0xf   :  { %187 = shalt.err (!%p184_p7)
}
  0x10   :  { %s215_s19 = smov 128   ;;  %s216_s20 = smov 8  }
  0x11   :  { %20 = dma.hbm_to_vmem [thread:$0]  %s267_s0, 256, %s15_s10, [#allocation3], %s215_s19, %s215_s19, %s216_s20  }
  0x12   :  { %210 = dma.done.wait [#allocation3], 256  }
  0x13   :  { %211 = vsyncadd [#allocation3], 4294967040  ;;  %v150_v0 = vld [vmem:[%s268_s1] ss:$0 sm:$0xff]  ;;  %vm37_vm0 = vcmask 261120   ;;  %v28_v2 = vld [vmem:[#allocation2 + $0x8] sm:$0xff]  ;;  %v46_v7 = vlaneseq }
  0x14   :  { %v27_v1 = vld [vmem:[#allocation2] sm:$0xff]  ;;  %v36_v4 = vmul.f32 %v150_v0, %v28_v2  ;;  %vm56_vm1 = vcmask 1041409   ;;  %vm59_vm2 = vcmask 58368   ;;  %v217_v17 = vmov 0   ;;  %s218_s0 = smov [#allocation5]  }
  0x15   :  { %v35_v3 = vmul.f32 %v150_v0, %v27_v1  ;;  %v47_v8 = vand.u32 127, %v46_v7  ;;  %v49_v9 = vshrl.u32 %v46_v7, 7  ;;  %157 = vset.pattern.permute.xlu0 %v217_v17  ;;  %156 = vset.pattern.permute.xlu1 %v217_v17  ;;  %s141_s1 = sshll.u32 %s218_s0, 4  ;;  %s142_s1 = int_to_ptr.vmem [resolvable:$true] %s141_s1 }
  0x16   :  { %v41_v6 = vsel %vm37_vm0, %v36_v4, 0.0  ;;  %s188_s25 = scalar_lea.vmem %s142_s1, 32  ;;  %p193_p9 = scmp.lt.s32.totalorder %s142_s1, %s142_s1 }
  0x17   :  { %v38_v5 = vsel %vm37_vm0, %v35_v3, 0.0  ;;  %v50_v11 = vsub.s32 %v47_v8, %v49_v9  ;;  %v66_v18 = vsub.s32 0, %v49_v9  ;;  %v70_v19 = vsub.s32 1, %v49_v9  ;;  %p189_p8 = scmp.ne.s32.totalorder %s142_s1, %s188_s25  ;;  %p194_p10 = scmp.lt.s32.totalorder %s188_s25, %s188_s25 }
  0x18   :  { %39 = vadd.xlane.f32.xlu0 %v38_v5 }
  0x19   :  { %p195_p11 = por %p194_p10, %p193_p9 }
  0x1b   :  { %p196_p12 = pnand %p195_p11, %p189_p8 }
  0x1c   :  { %42 = vadd.xlane.f32.xlu0 %v41_v6 }
  0xa5   :  { %v40_v10 = vpop.xlane.xlu0 %39 }
  0xa6   :  { %v51_v13 = vrot.slane %v40_v10, %v50_v11 }
  0xa9   :  { %v43_v12 = vpop.xlane.xlu0 %42 }
  0xaa   :  { %v55_v14 = vrot.slane %v43_v12, %v50_v11 }
  0xac   :  { %v57_v15 = vsel %vm56_vm1, %v55_v14, %v51_v13 }
  0xad   :  { %v60_v16 = vsel %vm59_vm2, %v57_v15, -inf }
  0xae   :  { %61 = vmax.xlane.f32.xlu1 %v60_v16 }
 0x13b   :  { %v62_v20 = vpop.xlane.xlu1 %61 }
 0x13c   :  { %v67_v21 = vrot.slane %v62_v20, %v66_v18  ;;  %v71_v22 = vrot.slane %v62_v20, %v70_v19 }
 0x13e   :  { %v74_v23 = vsub.f32 %v40_v10, %v67_v21  ;;  %v75_v24 = vsub.f32 %v43_v12, %v71_v22 }
 0x140   :  { %v76_v25 = vmul.f32 1.442695, %v74_v23  ;;  %v78_v26 = vmul.f32 1.442695, %v75_v24 }
 0x142   :  { %158 = vpow2.f32 %v76_v25 }
 0x143   :  { %160 = vpow2.f32 %v78_v26 }
 0x14c   :  { %v159_v27 = vpop.eup %158 }
 0x14d   :  { %v161_v28 = vpop.eup %160  ;;  %83 = vperm.xlu1 %156, %v159_v27  }
 0x14e   :  { %86 = vperm.xlu0 %157, %v161_v28  }
 0x1cc   :  { %v84_v29 = vpop.permute.xlu1 %83 }
 0x1cd   :  { %v87_v30 = vpop.permute.xlu0 %86  ;;  %v91_v31 = vrot.slane %v84_v29, %v50_v11 }
 0x1ce   :  { %v95_v32 = vrot.slane %v87_v30, %v50_v11 }
 0x1d0   :  { %v96_v33 = vsel %vm56_vm1, %v95_v32, %v91_v31 }
 0x1d1   :  { %v98_v34 = vsel %vm59_vm2, %v96_v33, 0.0 }
 0x1d2   :  { %99 = vadd.xlane.f32.xlu1 %v98_v34 }
 0x25f   :  { %v100_v35 = vpop.xlane.xlu1 %99 }
 0x260   :  { %v105_v36 = vrot.slane %v100_v35, %v66_v18  ;;  %v109_v37 = vrot.slane %v100_v35, %v70_v19 }
 0x262   :  { %162 = vrcp.f32 %v105_v36 }
 0x263   :  { %164 = vrcp.f32 %v109_v37 }
 0x26c   :  { %v163_v38 = vpop.eup %162 }
 0x26d   :  { %v113_v39 = vmul.f32 %v163_v38, %v159_v27  ;;  %v165_v40 = vpop.eup %164 }
 0x26e   :  { %v115_v41 = vmul.f32 %v165_v40, %v161_v28 }
 0x26f   :  { %119 = vperm.xlu0 %157, %v113_v39  }
 0x273   :  { %122 = vperm.xlu0 %157, %v115_v41  }
 0x2ee   :  { %v120_v42 = vpop.permute.xlu0 %119 }
 0x2ef   :  { %v127_v44 = vrot.slane %v120_v42, %v50_v11 }
 0x2f2   :  { %v123_v43 = vpop.permute.xlu0 %122 }
 0x2f3   :  { %v131_v45 = vrot.slane %v123_v43, %v50_v11 }
 0x2f5   :  { %v132_v46 = vsel %vm56_vm1, %v131_v45, %v127_v44 }
 0x2f6   :  { %134 = vst.msk [vmem:[#allocation5] sm:$0x3] %vm59_vm2, %v132_v46 }
 0x2f7   :  { %199 = shalt.err (!%p196_p12)
}
 0x2f8   :  { %s200_s28 = scalar_lea.hbm %s269_s2, 32 }
 0x2f9   :  { %p201_p13 = scmp.ne.s32.totalorder %s269_s2, %s200_s28  ;;  %p204_p0 = scmp.lt.u32.totalorder %s200_s28, %s269_s2 }
 0x2fb   :  { %p206_p1 = pnand %p204_p0, %p201_p13 }
 0x2fd   :  { %209 = shalt.err (!%p206_p1)
}
 0x2fe   :  { %144 = dma.vmem_to_hbm [thread:$0]  %s142_s1, 32, %s269_s2, [#allocation4]  }
 0x2ff   :  { %212 = dma.done.wait [#allocation4], 32  }
 0x300   :  { %213 = vsyncadd [#allocation4], 4294967264 }
 0x301   :  { %148 = vsyncpa [#allocation3], 1 }
 0x302   :  { %149 = vsyncpa [#allocation4], 1 }

</bundles_post_ra>
